<compile_context>
chip_gen: v6e
topology: v6e:2x2x1
jax: 0.10.0
libtpu: 0.0.40
codegen_flags: <defaults>
</compile_context>

<pallas_src>
import functools

import jax
import jax.numpy as jnp
from jax.experimental import pallas as pl
from jax.experimental.pallas import tpu as pltpu

POS_WEIGHT = 0.5
ALPHA = 1.0
EPS = 1e-6

_LANES = 128
_MAX_TILE_ELEMS = 4096 * 128          # ~2 MiB f32 per input tile (review: 4-8K rows)
_VMEM_LIMIT_BYTES = 32 * 1024 * 1024  # explicit; safe on v5e/v6e/v7x


def _cdiv(a, b):
    return -(-a // b)


def _wbce_kernel(pred_ref, true_ref, wlog_acc_ref, t_acc_ref, *,
                 pos_weight, eps, tile_n, num_inner, n_rows):
    c = pl.program_id(0)
    i = pl.program_id(1)

    @pl.when(i == 0)
    def _init():
        wlog_acc_ref[...] = jnp.zeros_like(wlog_acc_ref)
        t_acc_ref[...] = jnp.zeros_like(t_acc_ref)

    # In-kernel upcast keeps the HBM read in the input's native storage dtype.
    p = jnp.clip(pred_ref[...].astype(jnp.float32), eps, 1.0)   # torch.clamp(y_pred, eps, 1.0)
    t = true_ref[...].astype(jnp.float32)

    # Rows of this block beyond the true batch size (ragged tail / surplus
    # clamped blocks) are masked out; the mask is per-row, broadcast over lanes.
    row0 = (c * num_inner + i) * tile_n
    rows_left = n_rows - row0
    row_ids = jax.lax.broadcasted_iota(jnp.int32, (tile_n, 1), 0)
    valid = row_ids < rows_left                                   # (tile_n, 1)

    # Binary-target arithmetic forms (fewer VALU ops than two compare+selects):
    #   w   == where(t == 1, pos_weight, 1 - pos_weight)
    #   sel == where(t == 1, p, 1 - p)   -> single log per element
    # TODO(synk): soft (non-binary) labels would need the exact-compare + two-log form.
    w = (1.0 - pos_weight) + t * (2.0 * pos_weight - 1.0)
    sel = (1.0 - p) + t * (2.0 * p - 1.0)
    log_term = jnp.maximum(jnp.log(sel), -100.0)   # F.binary_cross_entropy clamps log at -100

    # Accumulate +w*log (negated once in the wrapper). The where() guarantees
    # masked rows contribute exactly 0 regardless of clamp/padding semantics.
    wlog = jnp.where(valid, w * log_term, 0.0)
    t_cnt = jnp.where(valid, t, 0.0)

    hw = pred_ref.shape[1]
    if tile_n % 8 == 0:
        # Pure-VPU fold: consecutive 8-row groups map straight onto the 8
        # sublanes of the accumulator (the reshape is a no-move view).
        wlog_acc_ref[...] += jnp.sum(wlog.reshape(tile_n // 8, 8, hw), axis=0)
        t_acc_ref[...] += jnp.sum(t_cnt.reshape(tile_n // 8, 8, hw), axis=0)
    else:
        # Tiny-batch case (tile_n == N < 8): a single block, perf-irrelevant.
        rows8 = jax.lax.broadcasted_iota(jnp.int32, (8, 1), 0)
        wlog_acc_ref[...] += jnp.where(rows8 == 0,
                                       jnp.sum(wlog, axis=0, keepdims=True), 0.0)
        t_acc_ref[...] += jnp.where(rows8 == 0,
                                    jnp.sum(t_cnt, axis=0, keepdims=True), 0.0)


def _wbce_sums(pred2, true2, hw, n_rows, pos_weight, eps):
    """pred2/true2: (R, D) views; the first `hw` columns of the first `n_rows`
    rows are the (channel-0) elements to reduce. Returns (sum(w*log), sum(t))."""
    # Tile size: ~2 MiB f32 per input tile amortizes the ~0.35us/grid-step cost
    # (>=85% of HBM roofline) while 2 inputs x 2 buffers stays ~8 MiB of VMEM.
    rows_cap = max(1, _MAX_TILE_ELEMS // hw)
    if n_rows <= rows_cap:
        tile_n = n_rows                      # block dim == full array dim is always legal
    else:
        tile_n = max(8, (rows_cap // 8) * 8)
    # TODO(synk): very large H*W (> ~0.5M elements) would also need a grid axis
    # over the spatial dim to keep a single tile inside VMEM.

    blocks = _cdiv(n_rows, tile_n)
    num_slices = 2 if blocks >= 2 else 1     # leading axis -> two TensorCores on v7x
    num_inner = _cdiv(blocks, num_slices)
    last_blk = blocks - 1

    def in_map(c, i):
        # Clamp: surplus steps (num_slices*num_inner > blocks) re-read the last
        # real block; the in-kernel row mask zeroes their contribution.
        return (jnp.minimum(c * num_inner + i, last_blk), 0)

    in_spec = pl.BlockSpec((tile_n, hw), in_map)
    acc_spec = pl.BlockSpec((8, hw), lambda c, i: (c, 0))

    kernel = functools.partial(
        _wbce_kernel, pos_weight=float(pos_weight), eps=float(eps),
        tile_n=tile_n, num_inner=num_inner, n_rows=n_rows)

    wlog_acc, t_acc = pl.pallas_call(
        kernel,
        out_shape=(
            jax.ShapeDtypeStruct((num_slices * 8, hw), jnp.float32),
            jax.ShapeDtypeStruct((num_slices * 8, hw), jnp.float32),
        ),
        grid_spec=pltpu.PrefetchScalarGridSpec(
            num_scalar_prefetch=0,
            grid=(num_slices, num_inner),
            in_specs=[in_spec, in_spec],
            out_specs=[acc_spec, acc_spec],
        ),
        compiler_params=pltpu.CompilerParams(
            dimension_semantics=("parallel", "arbitrary"),
            vmem_limit_bytes=_VMEM_LIMIT_BYTES,
        ),
    )(pred2, true2)

    # Single tiny cross-lane reduce on the (num_slices*8, hw) accumulators.
    return jnp.sum(wlog_acc), jnp.sum(t_acc)


def weighted_bce_loss(inp, target, pos_weight=POS_WEIGHT, alpha=ALPHA, eps=EPS):
    assert inp.shape == target.shape
    n, c = inp.shape[0], inp.shape[1]
    hw = 1
    for d in inp.shape[2:]:
        hw *= d

    # Free, contiguous reshapes: no HBM copies, no dtype casts.
    pred2 = inp.reshape(n, c * hw)
    true2 = target.reshape(n, c * hw)

    if hw % _LANES == 0:
        # Fast path: column-block 0 of the (N, C*H*W) view IS channel 0.
        wlog_sum, t_sum = _wbce_sums(pred2, true2, hw, n, pos_weight, eps)
    else:
        # TODO(synk): lane-ragged spatial sizes (H*W % 128 != 0) fall back to a
        # materialized channel-0 slab; padding with (pred=1, true=1) adds exactly
        # 0 BCE (relies on clamp upper bound == 1.0) and the static pad count is
        # subtracted from the target sum below.
        flat_p = pred2[:, :hw].reshape(-1)
        flat_t = true2[:, :hw].reshape(-1)
        rows = _cdiv(flat_p.shape[0], _LANES)
        pad = rows * _LANES - flat_p.shape[0]
        p2 = jnp.pad(flat_p, (0, pad), constant_values=1.0).reshape(rows, _LANES)
        t2 = jnp.pad(flat_t, (0, pad), constant_values=1.0).reshape(rows, _LANES)
        wlog_sum, t_sum = _wbce_sums(p2, t2, _LANES, rows, pos_weight, eps)
        t_sum = t_sum - jnp.float32(pad)

    bce_sum = -wlog_sum
    return (alpha * 2.0) * bce_sum / (t_sum + 1.0)


def weighted_bce_loss_ref(inp, target, pos_weight=POS_WEIGHT, alpha=ALPHA, eps=EPS):
    """Pure-JAX reference mirroring the PyTorch forward (two-log form)."""
    y_pred = inp[:, 0].reshape(-1)
    y_true = target[:, 0].reshape(-1)
    w = jnp.where(y_true == 1.0, pos_weight, 1.0 - pos_weight)
    y_pred = jnp.clip(y_pred, eps, 1.0)
    log_p = jnp.maximum(jnp.log(y_pred), -100.0)
    log_1mp = jnp.maximum(jnp.log(1.0 - y_pred), -100.0)
    bce = jnp.sum(-w * (y_true * log_p + (1.0 - y_true) * log_1mp))
    return alpha * 2.0 * bce / (jnp.sum(y_true) + 1.0)


if __name__ == "__main__":
    key = jax.random.PRNGKey(0)
    k1, k2 = jax.random.split(key)

    N, C, H, W = 2, 4, 16, 16
    # predictions are probabilities in (0, 1); targets are binary {0, 1}
    x = jax.random.uniform(k1, (N, C, H, W), dtype=jnp.float32,
                           minval=0.01, maxval=0.99)
    t = (jax.random.uniform(k2, (N, C, H, W), dtype=jnp.float32) > 0.5
         ).astype(jnp.float32)

    loss = weighted_bce_loss(x, t)
    jax.block_until_ready(loss)

    ref = weighted_bce_loss_ref(x, t)
    assert jnp.allclose(loss, ref, rtol=1e-4, atol=1e-5), (loss, ref)

    print("KERNEL_OK")
</pallas_src>

<mosaic_0001>
module attributes {stable_mosaic.version = 11 : i64} {
  func.func @_wbce_kernel(%arg0: i32, %arg1: i32, %arg2: memref<2x256xf32, #tpu.memory_space<vmem>>, %arg3: memref<2x256xf32, #tpu.memory_space<vmem>>, %arg4: memref<8x256xf32, #tpu.memory_space<vmem>>, %arg5: memref<8x256xf32, #tpu.memory_space<vmem>>) attributes {dimension_semantics = [#tpu.dimension_semantics<parallel>, #tpu.dimension_semantics<arbitrary>], iteration_bounds = array<i64: 1, 1>, scalar_prefetch = 0 : i64, scratch_operands = 0 : i64, tpu.core_type = #tpu.core_type<tc>, window_params = [{transform_indices = @transform_0, window_bounds = array<i64: 2, 256>}, {transform_indices = @transform_1, window_bounds = array<i64: 2, 256>}, {transform_indices = @transform_2, window_bounds = array<i64: 8, 256>}, {transform_indices = @transform_3, window_bounds = array<i64: 8, 256>}]} {
    %c0_i32 = arith.constant 0 : i32
    %0 = arith.cmpi eq, %arg1, %c0_i32 : i32
    %1 = arith.extui %0 : i1 to i32
    %c0_i32_0 = arith.constant 0 : i32
    %2 = arith.cmpi ne, %1, %c0_i32_0 : i32
    scf.if %2 {
      %cst_28 = arith.constant 0.000000e+00 : f32
      %67 = vector.broadcast %cst_28 : f32 to vector<8x256xf32>
      %c0_29 = arith.constant 0 : index
      %c0_30 = arith.constant 0 : index
      %68 = vector.load %arg4[%c0_29, %c0_30] : memref<8x256xf32, #tpu.memory_space<vmem>>, vector<8x256xf32>
      tpu.vector_store %arg4[%c0_29, %c0_30], %67 {strides = array<i32>} : memref<8x256xf32, #tpu.memory_space<vmem>>, vector<8x256xf32>,
      %cst_31 = arith.constant 0.000000e+00 : f32
      %69 = vector.broadcast %cst_31 : f32 to vector<8x256xf32>
      %c0_32 = arith.constant 0 : index
      %c0_33 = arith.constant 0 : index
      %70 = vector.load %arg5[%c0_32, %c0_33] : memref<8x256xf32, #tpu.memory_space<vmem>>, vector<8x256xf32>
      tpu.vector_store %arg5[%c0_32, %c0_33], %69 {strides = array<i32>} : memref<8x256xf32, #tpu.memory_space<vmem>>, vector<8x256xf32>,
    } else {
    }
    %c0 = arith.constant 0 : index
    %c0_1 = arith.constant 0 : index
    %3 = vector.load %arg2[%c0, %c0_1] : memref<2x256xf32, #tpu.memory_space<vmem>>, vector<2x256xf32>
    %cst = arith.constant 9.99999997E-7 : f32
    %cst_2 = arith.constant 1.000000e+00 : f32
    %4 = vector.broadcast %cst : f32 to vector<2x256xf32>
    %5 = arith.maximumf %4, %3 : vector<2x256xf32>
    %6 = vector.broadcast %cst_2 : f32 to vector<2x256xf32>
    %7 = arith.minimumf %6, %5 : vector<2x256xf32>
    %c0_3 = arith.constant 0 : index
    %c0_4 = arith.constant 0 : index
    %8 = vector.load %arg3[%c0_3, %c0_4] : memref<2x256xf32, #tpu.memory_space<vmem>>, vector<2x256xf32>
    %c1_i32 = arith.constant 1 : i32
    %9 = arith.muli %arg0, %c1_i32 : i32
    %10 = arith.addi %9, %arg1 : i32
    %c2_i32 = arith.constant 2 : i32
    %11 = arith.muli %10, %c2_i32 : i32
    %c2_i32_5 = arith.constant 2 : i32
    %12 = arith.subi %c2_i32_5, %11 : i32
    %13 = tpu.iota {dimensions = array<i32: 0>} : vector<2x1xi32>
    %14 = vector.broadcast %12 : i32 to vector<2x1xi32>
    %15 = arith.cmpi slt, %13, %14 : vector<2x1xi32>
    %cst_6 = arith.constant 0.000000e+00 : f32
    %16 = vector.broadcast %cst_6 : f32 to vector<2x256xf32>
    %17 = arith.mulf %8, %16 : vector<2x256xf32>
    %cst_7 = arith.constant 5.000000e-01 : f32
    %18 = vector.broadcast %cst_7 : f32 to vector<2x256xf32>
    %19 = arith.addf %18, %17 : vector<2x256xf32>
    %cst_8 = arith.constant 1.000000e+00 : f32
    %20 = vector.broadcast %cst_8 : f32 to vector<2x256xf32>
    %21 = arith.subf %20, %7 : vector<2x256xf32>
    %cst_9 = arith.constant 2.000000e+00 : f32
    %22 = vector.broadcast %cst_9 : f32 to vector<2x256xf32>
    %23 = arith.mulf %22, %7 : vector<2x256xf32>
    %cst_10 = arith.constant 1.000000e+00 : f32
    %24 = vector.broadcast %cst_10 : f32 to vector<2x256xf32>
    %25 = arith.subf %23, %24 : vector<2x256xf32>
    %26 = arith.mulf %8, %25 : vector<2x256xf32>
    %27 = arith.addf %21, %26 : vector<2x256xf32>
    %28 = math.log %27 : vector<2x256xf32>
    %cst_11 = arith.constant -1.000000e+02 : f32
    %29 = vector.broadcast %cst_11 : f32 to vector<2x256xf32>
    %30 = arith.maximumf %28, %29 : vector<2x256xf32>
    %31 = arith.mulf %19, %30 : vector<2x256xf32>
    %cst_12 = arith.constant 0.000000e+00 : f32
    %32 = vector.shape_cast %15 : vector<2x1xi1> to vector<2x1xi1>
    %33 = vector.broadcast %32 : vector<2x1xi1> to vector<2x256xi1>
    %34 = vector.broadcast %cst_12 : f32 to vector<2x256xf32>
    %35 = arith.select %33, %31, %34 : vector<2x256xi1>, vector<2x256xf32>
    %cst_13 = arith.constant 0.000000e+00 : f32
    %36 = vector.shape_cast %15 : vector<2x1xi1> to vector<2x1xi1>
    %37 = vector.broadcast %36 : vector<2x1xi1> to vector<2x256xi1>
    %38 = vector.broadcast %cst_13 : f32 to vector<2x256xf32>
    %39 = arith.select %37, %8, %38 : vector<2x256xi1>, vector<2x256xf32>
    %40 = tpu.iota {dimensions = array<i32: 0>} : vector<8x1xi32>
    %c0_14 = arith.constant 0 : index
    %c0_15 = arith.constant 0 : index
    %41 = vector.load %arg4[%c0_14, %c0_15] : memref<8x256xf32, #tpu.memory_space<vmem>>, vector<8x256xf32>
    %c0_i32_16 = arith.constant 0 : i32
    %42 = vector.broadcast %c0_i32_16 : i32 to vector<8x1xi32>
    %43 = arith.cmpi eq, %40, %42 : vector<8x1xi32>
    %cst_17 = arith.constant dense<0.000000e+00> : vector<256xf32>
    %44 = vector.multi_reduction <add>, %35, %cst_17 [0] : vector<2x256xf32> to vector<256xf32>
    %45 = vector.shape_cast %44 : vector<256xf32> to vector<1x256xf32>
    %cst_18 = arith.constant 0.000000e+00 : f32
    %46 = vector.shape_cast %43 : vector<8x1xi1> to vector<8x1xi1>
    %47 = vector.broadcast %46 : vector<8x1xi1> to vector<8x256xi1>
    %48 = vector.shape_cast %45 : vector<1x256xf32> to vector<1x256xf32>
    %49 = vector.broadcast %48 : vector<1x256xf32> to vector<8x256xf32>
    %50 = vector.broadcast %cst_18 : f32 to vector<8x256xf32>
    %51 = arith.select %47, %49, %50 : vector<8x256xi1>, vector<8x256xf32>
    %52 = arith.addf %41, %51 : vector<8x256xf32>
    %c0_19 = arith.constant 0 : index
    %c0_20 = arith.constant 0 : index
    %53 = vector.load %arg4[%c0_19, %c0_20] : memref<8x256xf32, #tpu.memory_space<vmem>>, vector<8x256xf32>
    tpu.vector_store %arg4[%c0_19, %c0_20], %52 {strides = array<i32>} : memref<8x256xf32, #tpu.memory_space<vmem>>, vector<8x256xf32>,
    %c0_21 = arith.constant 0 : index
    %c0_22 = arith.constant 0 : index
    %54 = vector.load %arg5[%c0_21, %c0_22] : memref<8x256xf32, #tpu.memory_space<vmem>>, vector<8x256xf32>
    %c0_i32_23 = arith.constant 0 : i32
    %55 = vector.broadcast %c0_i32_23 : i32 to vector<8x1xi32>
    %56 = arith.cmpi eq, %40, %55 : vector<8x1xi32>
    %cst_24 = arith.constant dense<0.000000e+00> : vector<256xf32>
    %57 = vector.multi_reduction <add>, %39, %cst_24 [0] : vector<2x256xf32> to vector<256xf32>
    %58 = vector.shape_cast %57 : vector<256xf32> to vector<1x256xf32>
    %cst_25 = arith.constant 0.000000e+00 : f32
    %59 = vector.shape_cast %56 : vector<8x1xi1> to vector<8x1xi1>
    %60 = vector.broadcast %59 : vector<8x1xi1> to vector<8x256xi1>
    %61 = vector.shape_cast %58 : vector<1x256xf32> to vector<1x256xf32>
    %62 = vector.broadcast %61 : vector<1x256xf32> to vector<8x256xf32>
    %63 = vector.broadcast %cst_25 : f32 to vector<8x256xf32>
    %64 = arith.select %60, %62, %63 : vector<8x256xi1>, vector<8x256xf32>
    %65 = arith.addf %54, %64 : vector<8x256xf32>
    %c0_26 = arith.constant 0 : index
    %c0_27 = arith.constant 0 : index
    %66 = vector.load %arg5[%c0_26, %c0_27] : memref<8x256xf32, #tpu.memory_space<vmem>>, vector<8x256xf32>
    tpu.vector_store %arg5[%c0_26, %c0_27], %65 {strides = array<i32>} : memref<8x256xf32, #tpu.memory_space<vmem>>, vector<8x256xf32>,
    return
  }
  func.func @transform_0(%arg0: i32, %arg1: i32) -> (i32, i32) {
    %c1_i32 = arith.constant 1 : i32
    %0 = arith.muli %arg0, %c1_i32 : i32
    %1 = arith.addi %0, %arg1 : i32
    %c0_i32 = arith.constant 0 : i32
    %2 = arith.minsi %1, %c0_i32 : i32
    %c0_i32_0 = arith.constant 0 : i32
    %c0_i32_1 = arith.constant 0 : i32
    return %2, %c0_i32_0 : i32, i32
  }
  func.func @transform_1(%arg0: i32, %arg1: i32) -> (i32, i32) {
    %c1_i32 = arith.constant 1 : i32
    %0 = arith.muli %arg0, %c1_i32 : i32
    %1 = arith.addi %0, %arg1 : i32
    %c0_i32 = arith.constant 0 : i32
    %2 = arith.minsi %1, %c0_i32 : i32
    %c0_i32_0 = arith.constant 0 : i32
    %c0_i32_1 = arith.constant 0 : i32
    return %2, %c0_i32_0 : i32, i32
  }
  func.func @transform_2(%arg0: i32, %arg1: i32) -> (i32, i32) {
    %c0_i32 = arith.constant 0 : i32
    %c0_i32_0 = arith.constant 0 : i32
    return %arg0, %c0_i32 : i32, i32
  }
  func.func @transform_3(%arg0: i32, %arg1: i32) -> (i32, i32) {
    %c0_i32 = arith.constant 0 : i32
    %c0_i32_0 = arith.constant 0 : i32
    return %arg0, %c0_i32 : i32, i32
  }
}

</mosaic_0001>

<bundles_post_ra>
// kernel: tpu_custom_call.1
= control target key start
LH: loop header
LB: loop body
LE: loop exit
PB: predicated region body
PF: predicated region fallthrough
CT: control target
= control target key end

     0   :  { %9 = vsyncpa [#allocation3], 0  ;;  %s356_s0 = inlined_call_operand.hbm [shape: f32[2,1024], index: 0, kind: input, shape index: {}]   ;;  %s357_s1 = inlined_call_operand.hbm [shape: f32[2,1024], index: 1, kind: input, shape index: {}]   ;;  %s358_s2 = inlined_call_operand.hbm [shape: f32[8,256], index: 2, kind: output, shape index: {0}]   ;;  %s359_s3 = inlined_call_operand.hbm [shape: f32[8,256], index: 3, kind: output, shape index: {1}]  }
   0x1   :  { %10 = vsyncpa [#allocation6], 0 }
   0x2   :  { %11 = vsyncpa [#allocation4], 0 }
   0x3   :  { %12 = vsyncpa [#allocation9], 0  ;;  %s294_s12 = smov [#allocation2]   ;;  %s295_s14 = smov [#allocation5]  }
   0x4   :  { %s25_s13 = sshll.u32 %s294_s12, 4  ;;  %s41_s15 = sshll.u32 %s295_s14, 4  ;;  %s26_s13 = int_to_ptr.vmem [resolvable:$true] %s25_s13  ;;  %s42_s15 = int_to_ptr.vmem [resolvable:$true] %s41_s15 }
   0x5   :  { %s214_s16 = scalar_lea.vmem %s26_s13, 64  ;;  %p219_p1 = scmp.lt.s32.totalorder %s26_s13, %s26_s13 }
   0x6   :  { %p215_p0 = scmp.ne.s32.totalorder %s26_s13, %s214_s16  ;;  %p220_p2 = scmp.lt.s32.totalorder %s214_s16, %s214_s16 }
   0x8   :  { %p221_p3 = por %p220_p2, %p219_p1 }
   0xa   :  { %p222_p4 = pnand %p221_p3, %p215_p0 }
   0xc   :  { %225 = shalt.err (!%p222_p4)
}
   0xd   :  { %28 = dma.hbm_to_vmem [thread:$0]  %s356_s0, 64, %s26_s13, [#allocation3]  }
   0xe   :  { %s234_s19 = scalar_lea.vmem %s42_s15, 64  ;;  %p239_p6 = scmp.lt.s32.totalorder %s42_s15, %s42_s15 }
   0xf   :  { %p235_p5 = scmp.ne.s32.totalorder %s42_s15, %s234_s19  ;;  %p240_p7 = scmp.lt.s32.totalorder %s234_s19, %s234_s19 }
  0x11   :  { %p241_p8 = por %p240_p7, %p239_p6 }
  0x13   :  { %p242_p9 = pnand %p241_p8, %p235_p5 }
  0x15   :  { %245 = shalt.err (!%p242_p9)
}
  0x16   :  { %44 = dma.hbm_to_vmem [thread:$0]  %s357_s1, 64, %s42_s15, [#allocation6]  }
  0x17   :  { %286 = dma.done.wait [#allocation3], 64  }
  0x18   :  { %287 = vsyncadd [#allocation3], 4294967232 }
  0x19   :  { %288 = dma.done.wait [#allocation6], 64  }
  0x1a   :  { %289 = vsyncadd [#allocation6], 4294967232  ;;  %v72_v0 = vlaneseq  ;;  %v296_v1 = vmov 1983009808   ;;  %v65_v6 = vld [vmem:[#allocation2] sm:$0xf] }
  0x1b   :  { %v91_v2 = vunpack.c.l.s4 %v296_v1  ;;  %v68_v7 = vld [vmem:[#allocation5] sm:$0xf]  ;;  %v66_v8 = vmax.f32 %v65_v6, 1e-06  ;;  %vm118_vm1 = vcmask 1041408   ;;  %s297_s0 = smov [#allocation8]  }
  0x1c   :  { %v325_v3 = vshrl.u32 %v72_v0, 7  ;;  %s179_s1 = sshll.u32 %s297_s0, 4  ;;  %v76_v35 = vmul.f32 0.0, %v68_v7  ;;  %s180_s1 = int_to_ptr.vmem [resolvable:$true] %s179_s1 }
  0x1d   :  { %v92_v4 = vunpack.c.0.s8 %v91_v2  ;;  %v67_v10 = vmin.f32 %v66_v8, 1.0  ;;  %s246_s22 = scalar_lea.vmem %s180_s1, 256  ;;  %p251_p11 = scmp.lt.s32.totalorder %s180_s1, %s180_s1 }
  0x1e   :  { %vm75_vm0 = vcmp.lt.s32.totalorder %v325_v3, 2  ;;  %vm117_vm2 = vcmp.eq.s32.totalorder %v325_v3, 0  ;;  %p247_p10 = scmp.ne.s32.totalorder %s180_s1, %s246_s22  ;;  %p252_p12 = scmp.lt.s32.totalorder %s246_s22, %s246_s22 }
  0x1f   :  { %v95_v5 = vsub.s32 %v92_v4, %v325_v3  ;;  %v79_v14 = vmul.f32 2.0, %v67_v10  ;;  %v78_v18 = vsub.f32 1.0, %v67_v10 }
  0x20   :  { %p253_p13 = por %p252_p12, %p251_p11 }
  0x21   :  { %v109_v9 = vrot.slane %v68_v7, %v95_v5  ;;  %v197_v19 = vadd.f32 -1.0, %v79_v14 }
  0x22   :  { %p254_p0 = pnand %p253_p13, %p247_p10 }
  0x23   :  { %v113_v11 = vsel %vm75_vm0, %v109_v9, 0.0  ;;  %v110_v12 = vcombine.high %v109_v9, %v109_v9  ;;  %v81_v22 = vmul.f32 %v197_v19, %v68_v7 }
  0x24   :  { %v143_v13 = vsel %vm118_vm1, %v113_v11, 0.0 }
  0x25   :  { %v144_v15 = vrot.slane %v143_v13, 4  ;;  %v114_v16 = vsel %vm75_vm0, %v110_v12, 0.0  ;;  %v82_v25 = vadd.f32 %v81_v22, %v78_v18 }
  0x26   :  { %v150_v17 = vsel %vm118_vm1, %v114_v16, 0.0 }
  0x27   :  { %v145_v20 = vadd.f32 %v144_v15, %v143_v13  ;;  %v151_v21 = vrot.slane %v150_v17, 4  ;;  %204 = vlog2.f32 %v82_v25 }
  0x29   :  { %v146_v23 = vrot.slane %v145_v20, 2  ;;  %v152_v24 = vadd.f32 %v151_v21, %v150_v17 }
  0x2b   :  { %v147_v26 = vadd.f32 %v146_v23, %v145_v20  ;;  %v153_v27 = vrot.slane %v152_v24, 2 }
  0x2d   :  { %v148_v28 = vrot.slane %v147_v26, 1  ;;  %v154_v29 = vadd.f32 %v153_v27, %v152_v24 }
  0x2f   :  { %v149_v30 = vadd.f32 %v148_v28, %v147_v26  ;;  %v155_v31 = vrot.slane %v154_v29, 1 }
  0x31   :  { %v157_v32 = vsel %vm117_vm2, %v149_v30, 0.0  ;;  %v156_v33 = vadd.f32 %v155_v31, %v154_v29 }
  0x32   :  { %161 = vst [vmem:[#allocation8] sm:$0xff] %v157_v32 }
  0x33   :  { %v158_v34 = vsel %vm117_vm2, %v156_v33, 0.0 }
  0x34   :  { %162 = vst [vmem:[#allocation8 + $0x8] sm:$0xff] %v158_v34 }
  0x35   :  { %257 = shalt.err (!%p254_p0)
}
  0x36   :  { %182 = dma.vmem_to_hbm [thread:$0]  %s180_s1, 256, %s359_s3, [#allocation9]   ;;  %v205_v36 = vpop.eup %204  ;;  %v77_v37 = vadd.f32 0.5, %v76_v35 }
  0x37   :  { %v84_v38 = vmul.f32 0.6931472, %v205_v36  ;;  %s298_s3 = smov [#allocation7]  }
  0x38   :  { %s169_s25 = sshll.u32 %s298_s3, 4  ;;  %s170_s25 = int_to_ptr.vmem [resolvable:$true] %s169_s25 }
  0x39   :  { %v85_v39 = vmax.f32 %v84_v38, -100.0  ;;  %s266_s26 = scalar_lea.vmem %s170_s25, 256  ;;  %p271_p2 = scmp.lt.s32.totalorder %s170_s25, %s170_s25 }
  0x3a   :  { %p267_p1 = scmp.ne.s32.totalorder %s170_s25, %s266_s26  ;;  %p272_p3 = scmp.lt.s32.totalorder %s266_s26, %s266_s26 }
  0x3b   :  { %v86_v40 = vmul.f32 %v85_v39, %v77_v37 }
  0x3c   :  { %p273_p4 = por %p272_p3, %p271_p2 }
  0x3d   :  { %v96_v41 = vrot.slane %v86_v40, %v95_v5 }
  0x3e   :  { %p274_p5 = pnand %p273_p4, %p267_p1 }
  0x3f   :  { %v100_v42 = vsel %vm75_vm0, %v96_v41, 0.0  ;;  %v97_v43 = vcombine.high %v96_v41, %v96_v41 }
  0x40   :  { %v119_v44 = vsel %vm118_vm1, %v100_v42, 0.0 }
  0x41   :  { %v120_v45 = vrot.slane %v119_v44, 4  ;;  %v101_v46 = vsel %vm75_vm0, %v97_v43, 0.0 }
  0x42   :  { %v126_v47 = vsel %vm118_vm1, %v101_v46, 0.0 }
  0x43   :  { %v121_v48 = vadd.f32 %v120_v45, %v119_v44  ;;  %v127_v49 = vrot.slane %v126_v47, 4 }
  0x45   :  { %v122_v50 = vrot.slane %v121_v48, 2  ;;  %v128_v51 = vadd.f32 %v127_v49, %v126_v47 }
  0x47   :  { %v123_v52 = vadd.f32 %v122_v50, %v121_v48  ;;  %v129_v53 = vrot.slane %v128_v51, 2 }
  0x49   :  { %v124_v54 = vrot.slane %v123_v52, 1  ;;  %v130_v55 = vadd.f32 %v129_v53, %v128_v51 }
  0x4b   :  { %v125_v56 = vadd.f32 %v124_v54, %v123_v52  ;;  %v131_v57 = vrot.slane %v130_v55, 1 }
  0x4d   :  { %v135_v58 = vsel %vm117_vm2, %v125_v56, 0.0  ;;  %v132_v59 = vadd.f32 %v131_v57, %v130_v55 }
  0x4e   :  { %139 = vst [vmem:[#allocation7] sm:$0xff] %v135_v58 }
  0x4f   :  { %v136_v60 = vsel %vm117_vm2, %v132_v59, 0.0 }
  0x50   :  { %140 = vst [vmem:[#allocation7 + $0x8] sm:$0xff] %v136_v60 }
  0x51   :  { %277 = shalt.err (!%p274_p5)
}
  0x52   :  { %172 = dma.vmem_to_hbm [thread:$0]  %s170_s25, 256, %s358_s2, [#allocation4]  }
  0x53   :  { %290 = dma.done.wait [#allocation4], 256  }
  0x54   :  { %291 = vsyncadd [#allocation4], 4294967040 }
  0x55   :  { %292 = dma.done.wait [#allocation9], 256  }
  0x56   :  { %293 = vsyncadd [#allocation9], 4294967040 }
  0x57   :  { %189 = vsyncpa [#allocation3], 1 }
  0x58   :  { %190 = vsyncpa [#allocation6], 1 }
  0x59   :  { %191 = vsyncpa [#allocation4], 1 }
  0x5a   :  { %192 = vsyncpa [#allocation9], 1 }

</bundles_post_ra>
